<compile_context>
chip_gen: v5e
topology: v5e:2x2
jax: 0.10.0
libtpu: 0.0.40
codegen_flags: <defaults>
</compile_context>

<pallas_src>
import jax
import jax.numpy as jnp
import numpy as np
from jax.experimental import pallas as pl
from jax.experimental.pallas import tpu as pltpu

BN_EPS = 1e-5
NEG_SLOPE = 0.1
DEFAULT_TILE_B = 1024  # max batch tile (multiple of 8)


def mlp_kernel(x_ref, w1_ref, b1_ref, w2_ref, b2_ref, o_ref):
    # hidden layer: Linear (BatchNorm + bias pre-folded into w1/b1) -> LeakyReLU
    x = x_ref[...].astype(jnp.bfloat16)                         # in-kernel cast (VPU)
    h = jnp.dot(x, w1_ref[...],
                preferred_element_type=jnp.float32)             # (TB, H) f32 on MXU
    h = h + b1_ref[...]                                         # bias broadcast (1, H)
    h = jnp.where(h >= 0.0, h, NEG_SLOPE * h)                   # LeakyReLU(0.1), f32

    # output layer: Linear, output dim padded only to 8 columns
    out = jnp.dot(h.astype(jnp.bfloat16), w2_ref[...],
                  preferred_element_type=jnp.float32)           # (TB, OP) on MXU
    o_ref[...] = out + b2_ref[...]


def _round_up(n, m):
    return ((n + m - 1) // m) * m


def _choose_tiling(B, tile_b):
    """Pick (tile_b, padded_B) minimizing padding; >=2 grid steps when possible
    so v7x can shard the batch axis across its 2 TensorCores."""
    min_steps = 2 if B >= 16 else 1
    n_steps = max(pl.cdiv(B, tile_b), min_steps)
    tb = _round_up(pl.cdiv(B, n_steps), 8)
    pb = _round_up(B, tb)
    return tb, pb


def mlp_forward(x, params, tile_b=DEFAULT_TILE_B):
    """x: (B, F) float32.  params: dict from init_params (BN already folded)."""
    B, F = x.shape
    out_size = params["out_size"]
    w1, b1, w2, b2 = params["w1f"], params["b1f"], params["w2p"], params["b2p"]
    H = w1.shape[1]
    OP = w2.shape[1]

    tb, pb = _choose_tiling(B, tile_b)
    if pb != B:
        # minimal zero-padding of the ragged last tile (<= tb-1 rows)
        x = jnp.pad(x, ((0, pb - B), (0, 0)))

    out = pl.pallas_call(
        mlp_kernel,
        out_shape=jax.ShapeDtypeStruct((pb, OP), jnp.float32),
        grid=(pb // tb,),
        in_specs=[
            pl.BlockSpec((tb, F), lambda i: (i, 0)),   # x: f32, tiled over batch
            pl.BlockSpec((F, H), lambda i: (0, 0)),    # w1 (bf16): resident
            pl.BlockSpec((1, H), lambda i: (0, 0)),    # b1 (f32): resident
            pl.BlockSpec((H, OP), lambda i: (0, 0)),   # w2 (bf16, padded to 8): resident
            pl.BlockSpec((1, OP), lambda i: (0, 0)),   # b2 (f32, padded to 8): resident
        ],
        out_specs=pl.BlockSpec((tb, OP), lambda i: (i, 0)),
        compiler_params=pltpu.CompilerParams(
            dimension_semantics=("parallel",)),        # v7x: shard batch over 2 TCs
    )(x, w1, b1, w2, b2)

    return out[:B, :out_size]


def init_params(key, input_size, hidden_size, output_size):
    """Parameter init matching MlpNetwork.__init__, with BatchNorm folded.

    Linear weights: Kaiming-normal, a=0.1, mode='fan_in', nonlinearity='leaky_relu'.
    Linear biases: PyTorch default U(-1/sqrt(fan_in), 1/sqrt(fan_in)).
    BatchNorm1d (eval defaults): gamma=1, beta=0, running_mean=0, running_var=1.
    Folding: w1' = w1 * s, b1' = (b1 - mean) * s + beta, with s = gamma*rsqrt(var+eps).
    """
    k1, k2, k3, k4 = jax.random.split(key, 4)
    gain = float(np.sqrt(2.0 / (1.0 + NEG_SLOPE ** 2)))

    def kaiming(k, fan_in, fan_out):
        std = gain / float(np.sqrt(fan_in))
        return std * jax.random.normal(k, (fan_in, fan_out), dtype=jnp.float32)

    def bias(k, fan_in, fan_out):
        bound = 1.0 / float(np.sqrt(fan_in))
        return jax.random.uniform(k, (1, fan_out), dtype=jnp.float32,
                                  minval=-bound, maxval=bound)

    w1 = kaiming(k1, input_size, hidden_size)
    b1 = bias(k2, input_size, hidden_size)
    gamma = jnp.ones((1, hidden_size), jnp.float32)
    beta = jnp.zeros((1, hidden_size), jnp.float32)
    mean = jnp.zeros((1, hidden_size), jnp.float32)
    var = jnp.ones((1, hidden_size), jnp.float32)

    # fold BatchNorm (eval) + first bias into the first Linear
    scale = gamma * jax.lax.rsqrt(var + BN_EPS)          # (1, H)
    w1f = (w1 * scale).astype(jnp.bfloat16)              # (F, H) bf16
    b1f = (b1 - mean) * scale + beta                     # (1, H) f32

    # second Linear, output dim padded only up to the next multiple of 8
    out_pad = _round_up(output_size, 8)
    w2 = kaiming(k3, hidden_size, output_size)
    b2 = bias(k4, hidden_size, output_size)
    w2p = jnp.zeros((hidden_size, out_pad), jnp.float32).at[:, :output_size].set(w2)
    b2p = jnp.zeros((1, out_pad), jnp.float32).at[:, :output_size].set(b2)

    return {
        "w1f": w1f,
        "b1f": b1f,
        "w2p": w2p.astype(jnp.bfloat16),
        "b2p": b2p,
        "out_size": output_size,
    }


def reference_forward_bf16(x, p):
    """Plain-JAX reference mirroring the kernel's bf16/f32 dtype handling."""
    h = jnp.dot(x.astype(jnp.bfloat16), p["w1f"],
                preferred_element_type=jnp.float32) + p["b1f"]
    h = jnp.where(h >= 0.0, h, NEG_SLOPE * h)
    out = jnp.dot(h.astype(jnp.bfloat16), p["w2p"],
                  preferred_element_type=jnp.float32) + p["b2p"]
    return out[:, :p["out_size"]]


def reference_forward_f32(x, p):
    """Full-f32 reference of the original (unfolded-equivalent) forward."""
    h = jnp.dot(x, p["w1f"].astype(jnp.float32)) + p["b1f"]
    h = jnp.where(h >= 0.0, h, NEG_SLOPE * h)
    out = jnp.dot(h, p["w2p"].astype(jnp.float32)) + p["b2p"]
    return out[:, :p["out_size"]]


if __name__ == "__main__":
    INPUT_SIZE = 32
    HIDDEN_SIZE = 256   # default hidden_sizes=(256,)
    OUTPUT_SIZE = 1

    key = jax.random.PRNGKey(0)
    kx, kp = jax.random.split(key)
    params = init_params(kp, INPUT_SIZE, HIDDEN_SIZE, OUTPUT_SIZE)

    # small batch (single tile) and a larger ragged batch (multi-tile grid + minimal padding)
    for batch in (8, 520):
        xk = jax.random.fold_in(kx, batch)
        x = jax.random.normal(xk, (batch, INPUT_SIZE), dtype=jnp.float32)

        out = mlp_forward(x, params)
        out = jax.block_until_ready(out)
        assert out.shape == (batch, OUTPUT_SIZE)

        ref_bf16 = reference_forward_bf16(x, params)
        np.testing.assert_allclose(np.asarray(out), np.asarray(ref_bf16),
                                   rtol=1e-2, atol=1e-2)
        ref_f32 = reference_forward_f32(x, params)
        np.testing.assert_allclose(np.asarray(out), np.asarray(ref_f32),
                                   rtol=5e-2, atol=5e-2)

    print("KERNEL_OK")
</pallas_src>

<mosaic_0001>
module attributes {stable_mosaic.version = 11 : i64} {
  func.func @mlp_kernel(%arg0: i32, %arg1: memref<8x32xf32, #tpu.memory_space<vmem>>, %arg2: memref<32x256xbf16, #tpu.memory_space<vmem>>, %arg3: memref<1x256xf32, #tpu.memory_space<vmem>>, %arg4: memref<256x8xbf16, #tpu.memory_space<vmem>>, %arg5: memref<1x8xf32, #tpu.memory_space<vmem>>, %arg6: memref<8x8xf32, #tpu.memory_space<vmem>>) attributes {dimension_semantics = [#tpu.dimension_semantics<parallel>], iteration_bounds = array<i64: 1>, scalar_prefetch = 0 : i64, scratch_operands = 0 : i64, tpu.core_type = #tpu.core_type<tc>, window_params = [{transform_indices = @transform_0, window_bounds = array<i64: 8, 32>}, {pipeline_mode = #tpu.pipeline_mode<synchronous>, transform_indices = @transform_1, window_bounds = array<i64: 32, 256>}, {pipeline_mode = #tpu.pipeline_mode<synchronous>, transform_indices = @transform_2, window_bounds = array<i64: 1, 256>}, {pipeline_mode = #tpu.pipeline_mode<synchronous>, transform_indices = @transform_3, window_bounds = array<i64: 256, 8>}, {pipeline_mode = #tpu.pipeline_mode<synchronous>, transform_indices = @transform_4, window_bounds = array<i64: 1, 8>}, {transform_indices = @transform_5, window_bounds = array<i64: 8, 8>}]} {
    %c0 = arith.constant 0 : index
    %c0_0 = arith.constant 0 : index
    %0 = vector.load %arg1[%c0, %c0_0] : memref<8x32xf32, #tpu.memory_space<vmem>>, vector<8x32xf32>
    %1 = arith.truncf %0 : vector<8x32xf32> to vector<8x32xbf16>
    %c0_1 = arith.constant 0 : index
    %c0_2 = arith.constant 0 : index
    %2 = vector.load %arg2[%c0_1, %c0_2] : memref<32x256xbf16, #tpu.memory_space<vmem>>, vector<32x256xbf16>
    %cst = arith.constant dense<0.000000e+00> : vector<8x256xf32>
    %3 = tpu.matmul %1, %2, %cst {dimension_numbers = #tpu.dot_dimension_numbers<[1], [0], [0], [1], [0, 0, 1, 1], [], []>} : vector<8x32xbf16>, vector<32x256xbf16>, vector<8x256xf32> -> vector<8x256xf32>
    %c0_3 = arith.constant 0 : index
    %c0_4 = arith.constant 0 : index
    %4 = vector.load %arg3[%c0_3, %c0_4] : memref<1x256xf32, #tpu.memory_space<vmem>>, vector<1x256xf32>
    %5 = vector.broadcast %4 : vector<1x256xf32> to vector<8x256xf32>
    %6 = arith.addf %3, %5 : vector<8x256xf32>
    %cst_5 = arith.constant 0.000000e+00 : f32
    %7 = vector.broadcast %cst_5 : f32 to vector<8x256xf32>
    %8 = arith.cmpf oge, %6, %7 : vector<8x256xf32>
    %cst_6 = arith.constant 1.000000e-01 : f32
    %9 = vector.broadcast %cst_6 : f32 to vector<8x256xf32>
    %10 = arith.mulf %9, %6 : vector<8x256xf32>
    %11 = arith.select %8, %6, %10 : vector<8x256xi1>, vector<8x256xf32>
    %12 = arith.truncf %11 : vector<8x256xf32> to vector<8x256xbf16>
    %c0_7 = arith.constant 0 : index
    %c0_8 = arith.constant 0 : index
    %13 = vector.load %arg4[%c0_7, %c0_8] : memref<256x8xbf16, #tpu.memory_space<vmem>>, vector<256x8xbf16>
    %cst_9 = arith.constant dense<0.000000e+00> : vector<8x8xf32>
    %14 = tpu.matmul %12, %13, %cst_9 {dimension_numbers = #tpu.dot_dimension_numbers<[1], [0], [0], [1], [0, 0, 1, 1], [], []>} : vector<8x256xbf16>, vector<256x8xbf16>, vector<8x8xf32> -> vector<8x8xf32>
    %c0_10 = arith.constant 0 : index
    %c0_11 = arith.constant 0 : index
    %15 = vector.load %arg5[%c0_10, %c0_11] : memref<1x8xf32, #tpu.memory_space<vmem>>, vector<1x8xf32>
    %16 = vector.broadcast %15 : vector<1x8xf32> to vector<8x8xf32>
    %17 = arith.addf %14, %16 : vector<8x8xf32>
    %c0_12 = arith.constant 0 : index
    %c0_13 = arith.constant 0 : index
    %18 = vector.load %arg6[%c0_12, %c0_13] : memref<8x8xf32, #tpu.memory_space<vmem>>, vector<8x8xf32>
    tpu.vector_store %arg6[%c0_12, %c0_13], %17 {strides = array<i32>} : memref<8x8xf32, #tpu.memory_space<vmem>>, vector<8x8xf32>,
    return
  }
  func.func @transform_0(%arg0: i32) -> (i32, i32) {
    %c0_i32 = arith.constant 0 : i32
    %c0_i32_0 = arith.constant 0 : i32
    return %arg0, %c0_i32 : i32, i32
  }
  func.func @transform_1(%arg0: i32) -> (i32, i32) {
    %c0_i32 = arith.constant 0 : i32
    %c0_i32_0 = arith.constant 0 : i32
    %c0_i32_1 = arith.constant 0 : i32
    return %c0_i32, %c0_i32_0 : i32, i32
  }
  func.func @transform_2(%arg0: i32) -> (i32, i32) {
    %c0_i32 = arith.constant 0 : i32
    %c0_i32_0 = arith.constant 0 : i32
    %c0_i32_1 = arith.constant 0 : i32
    return %c0_i32, %c0_i32_0 : i32, i32
  }
  func.func @transform_3(%arg0: i32) -> (i32, i32) {
    %c0_i32 = arith.constant 0 : i32
    %c0_i32_0 = arith.constant 0 : i32
    %c0_i32_1 = arith.constant 0 : i32
    return %c0_i32, %c0_i32_0 : i32, i32
  }
  func.func @transform_4(%arg0: i32) -> (i32, i32) {
    %c0_i32 = arith.constant 0 : i32
    %c0_i32_0 = arith.constant 0 : i32
    %c0_i32_1 = arith.constant 0 : i32
    return %c0_i32, %c0_i32_0 : i32, i32
  }
  func.func @transform_5(%arg0: i32) -> (i32, i32) {
    %c0_i32 = arith.constant 0 : i32
    %c0_i32_0 = arith.constant 0 : i32
    return %arg0, %c0_i32 : i32, i32
  }
}

</mosaic_0001>

<bundles_post_ra>
// kernel: tpu_custom_call.1
= control target key start
LH: loop header
LB: loop body
LE: loop exit
PB: predicated region body
PF: predicated region fallthrough
CT: control target
= control target key end

     0   :  { %vm54_vm0 = vcmask 261120   ;;  %s513_s0 = inlined_call_operand.vmem [shape: f32[8,32], index: 0, kind: input, shape index: {}]   ;;  %s514_s1 = inlined_call_operand.vmem [shape: bf16[32,256], index: 1, kind: input, shape index: {}]   ;;  %s515_s2 = inlined_call_operand.vmem [shape: f32[1,256], index: 2, kind: input, shape index: {}]   ;;  %s516_s3 = inlined_call_operand.vmem [shape: bf16[256,8], index: 3, kind: input, shape index: {}]   ;;  %s517_s4 = inlined_call_operand.vmem [shape: f32[1,8], index: 4, kind: input, shape index: {}]   ;;  %s518_s5 = inlined_call_operand.hbm [shape: f32[8,8], index: 5, kind: output, shape index: {}]  }
   0x1   :  { %v278_v0 = vld [vmem:[%s514_s1 + $0x10] sm:$0xf]  ;;  %v353_v1 = vld [vmem:[%s514_s1 + $0x14] sm:$0xf0]  ;;  %v352_v2 = vld [vmem:[%s514_s1 + $0x14] sm:$0xf] }
   0x2   :  { %v279_v3 = vor.u32 %v353_v1, %v278_v0  ;;  %v280_v4 = vld [vmem:[%s514_s1 + $0x18] sm:$0xf0]  ;;  %v270_v5 = vld [vmem:[%s514_s1] sm:$0xf]  ;;  %v351_v6 = vld [vmem:[%s514_s1 + $0x4] sm:$0xf0] }
   0x3   :  { %v283_v7 = vor.u32 %v352_v2, %v280_v4  ;;  %v350_v8 = vld [vmem:[%s514_s1 + $0x4] sm:$0xf]  ;;  %v272_v9 = vld [vmem:[%s514_s1 + $0x8] sm:$0xf0]  ;;  %v271_v10 = vor.u32 %v351_v6, %v270_v5  ;;  %v361_v12 = vld [vmem:[%s516_s3 + $0x38] sm:$0xff] }
   0x4   :  { %64 = vmatpush.bf16.msra.mxu0 %v279_v3  ;;  %v22_v11 = vld [vmem:[%s513_s0] sm:$0xff]  ;;  %v369_v13 = vld [vmem:[%s516_s3 + $0x78] sm:$0xff]  ;;  %v275_v14 = vor.u32 %v350_v8, %v272_v9  ;;  %224 = vmatpush.bf16.msra.mxu2 %v361_v12  ;;  %v360_v15 = vld [vmem:[%s516_s3 + $0x30] sm:$0xff] }
   0x5   :  { %77 = vmatpush.bf16.msra.mxu1 %v283_v7  ;;  %237 = vmatpush.bf16.msra.mxu3 %v369_v13  ;;  %v368_v16 = vld [vmem:[%s516_s3 + $0x70] sm:$0xff]  ;;  %v23_v17 = vpack.c.bf16 %v22_v11, %v22_v11 }
   0x8   :  { %65 = vmatpush.bf16.msra.mxu0 %v271_v10 }
   0x9   :  { %10 = vsyncpa [#allocation3], 0  ;;  %78 = vmatpush.bf16.msra.mxu1 %v275_v14  ;;  %225 = vmatpush.bf16.msra.mxu2 %v360_v15  ;;  %v359_v18 = vld [vmem:[%s516_s3 + $0x28] sm:$0xff]  ;;  %v358_v20 = vld [vmem:[%s516_s3 + $0x20] sm:$0xff]  ;;  %s398_s17 = smov [#allocation2]   ;;  %s259_s20 = sshll.u32 %s518_s5, 4  ;;  %s260_s20 = int_to_ptr.hbm [resolvable:$true] %s259_s20 }
   0xa   :  { %238 = vmatpush.bf16.msra.mxu3 %v368_v16  ;;  %v367_v19 = vld [vmem:[%s516_s3 + $0x68] sm:$0xff]  ;;  %v366_v21 = vld [vmem:[%s516_s3 + $0x60] sm:$0xff]  ;;  %v357_v22 = vld [vmem:[%s516_s3 + $0x18] sm:$0xff]  ;;  %s257_s0 = sshll.u32 %s398_s17, 4  ;;  %vm250_vm3 = vcmask 64512   ;;  %s258_s0 = int_to_ptr.vmem [resolvable:$true] %s257_s0 }
   0xb   :  { %284 = vmatmul.msk.bf16.vlgmr.msra.gmra.mxu0 %vm54_vm0, %v23_v17  ;;  %v365_v23 = vld [vmem:[%s516_s3 + $0x58] sm:$0xff]  ;;  %v356_v24 = vld [vmem:[%s516_s3 + $0x10] sm:$0xff]  ;;  %v355_v26 = vld [vmem:[%s516_s3 + $0x8] sm:$0xff] }
   0xc   :  { %285 = vmatmul.msk.bf16.vlgmr.msra.gmra.mxu1 %vm54_vm0, %v23_v17  ;;  %v364_v25 = vld [vmem:[%s516_s3 + $0x50] sm:$0xff]  ;;  %v363_v27 = vld [vmem:[%s516_s3 + $0x48] sm:$0xff]  ;;  %v354_v28 = vld [vmem:[%s516_s3] sm:$0xff] }
   0xd   :  { %226 = vmatpush.bf16.msra.mxu2 %v359_v18  ;;  %v362_v29 = vld [vmem:[%s516_s3 + $0x40] sm:$0xff] }
   0xe   :  { %239 = vmatpush.bf16.msra.mxu3 %v367_v19  ;;  %v28_v30 = vld [vmem:[%s515_s2] sm:$0x3] }
   0xf   :  { %v30_v31 = vperm.slane %v28_v30, 0  ;;  %v31_v32 = vperm.slane %v28_v30, 1  ;;  %v371_v45 = vld [vmem:[%s517_s4] ss:$0 sm:$0xff] }
  0x11   :  { %227 = vmatpush.bf16.msra.mxu2 %v358_v20 }
  0x12   :  { %240 = vmatpush.bf16.msra.mxu3 %v366_v21 }
  0x15   :  { %228 = vmatpush.bf16.msra.mxu2 %v357_v22 }
  0x16   :  { %241 = vmatpush.bf16.msra.mxu3 %v365_v23 }
  0x19   :  { %229 = vmatpush.bf16.msra.mxu2 %v356_v24 }
  0x1a   :  { %242 = vmatpush.bf16.msra.mxu3 %v364_v25 }
  0x1d   :  { %230 = vmatpush.bf16.msra.mxu2 %v355_v26 }
  0x1e   :  { %243 = vmatpush.bf16.msra.mxu3 %v363_v27 }
  0x21   :  { %231 = vmatpush.bf16.msra.mxu2 %v354_v28 }
  0x22   :  { %244 = vmatpush.bf16.msra.mxu3 %v362_v29 }
  0x88   :  { %v67_v33 = vpop.f32.mrf.mxu0 }
  0x89   :  { %v68_v34 = vadd.f32 %v67_v33, %v30_v31  ;;  %v80_v35 = vpop.f32.mrf.mxu1 }
  0x8a   :  { %v81_v36 = vadd.f32 %v80_v35, %v31_v32 }
  0x8b   :  { %v86_v37 = vmul.f32 0.1, %v68_v34  ;;  %vm84_vm1 = vcmp.ge.f32.partialorder %v68_v34, 0.0 }
  0x8c   :  { %v87_v38 = vmul.f32 0.1, %v81_v36  ;;  %vm85_vm2 = vcmp.ge.f32.partialorder %v81_v36, 0.0 }
  0x8d   :  { %v88_v39 = vsel %vm84_vm1, %v68_v34, %v86_v37 }
  0x8e   :  { %v90_v40 = vpack.c.bf16 %v88_v39, %v88_v39  ;;  %v89_v41 = vsel %vm85_vm2, %v81_v36, %v87_v38 }
  0x8f   :  { %v91_v42 = vpack.c.bf16 %v89_v41, %v89_v41 }
  0x90   :  { %v69_v43 = vpop.f32.mrf.mxu0  ;;  %232 = vmatmul.bf16.vlgmr.msra.gmra.mxu2 %v90_v40 }
  0x91   :  { %v82_v44 = vpop.f32.mrf.mxu1  ;;  %245 = vmatmul.bf16.vlgmr.msra.gmra.mxu3 %v91_v42 }
 0x113   :  { %v233_v46 = vpop.f32.mrf.mxu2 }
 0x114   :  { %v234_v47 = vadd.f32 %v371_v45, %v233_v46  ;;  %v246_v48 = vpop.f32.mrf.mxu3 }
 0x116   :  { %v247_v49 = vadd.f32 %v246_v48, %v234_v47 }
 0x118   :  { %251 = vst.msk [vmem:[#allocation2] sm:$0xff] %vm250_vm3, %v247_v49 }
 0x119   :  { %262 = dma.vmem_to_hbm [thread:$0]  %s258_s0, 128, %s260_s20, [#allocation3]  }
 0x11b   :  { %v235_v50 = vpop.f32.mrf.mxu2 }
 0x11c   :  { %v248_v51 = vpop.f32.mrf.mxu3 }
 0x11d   :  { %396 = dma.done.wait [#allocation3], 128  }
 0x11e   :  { %397 = vsyncadd [#allocation3], 4294967168 }
 0x11f   :  { %267 = vsyncpa [#allocation3], 1 }

</bundles_post_ra>
